<compile_context>
chip_gen: v7x
topology: tpu7x:2x2x1
jax: 0.10.0
libtpu: 0.0.40
codegen_flags: <defaults>
</compile_context>

<pallas_src>
import jax
import jax.numpy as jnp
from jax.experimental import pallas as pl
from jax.experimental.pallas import tpu as pltpu


def _scale_exp_kernel(scale_ref, x_ref, o_ref):
    # scale_ref: SMEM (1,) f32 scalar; x_ref / o_ref: VMEM (block_rows, lane).
    # On a ragged final block the out-of-bounds rows hold stale data; exp on
    # them may produce inf but those rows are never written back (clipped DMA).
    s = scale_ref[0]
    x = x_ref[...].astype(jnp.float32)
    o_ref[...] = jnp.exp(x * s).astype(o_ref.dtype)


def _tpu_block_config():
    """Return (target_block_bytes, vmem_limit_bytes), tuned per TPU generation."""
    try:
        kind = jax.devices()[0].device_kind.lower()
    except Exception:  # pragma: no cover - be robust to exotic backends
        kind = ""
    if "7" in kind:
        # v7x: ~3.2 TB/s per TC makes the ~0.35 us per-step overhead visible at
        # small blocks -> 8 MiB blocks. 2 arrays x 2 buffers x 8 MiB = 32 MiB,
        # stay under a 40 MiB scoped limit (64 MiB physical VMEM per TC).
        return 8 << 20, 40 << 20
    # v5e / v6e (and unknown): 4 MiB blocks. 2 x 2 x 4 MiB = 16 MiB; raise the
    # scoped-VMEM limit to 32 MiB so v5e (16 MiB default) keeps full
    # double-buffering with headroom.
    return 4 << 20, 32 << 20


def scale_exp(x, scale):
    """Compute exp(x * scale) with a tiled, pipelined Pallas TPU kernel.

    x:     any-shape float array (e.g. NCHW activations)
    scale: shape (1,) learnable scalar (kept in f32 inside the kernel)
    """
    orig_shape = x.shape
    orig_dtype = x.dtype
    n = x.size
    if n == 0:
        return x

    scale_f32 = jnp.asarray(scale, dtype=jnp.float32).reshape(1)

    itemsize = x.dtype.itemsize
    # Minimum sublane tile per dtype: f32 -> 8, bf16 -> 16, int8/fp8 -> 32.
    sublane = {4: 8, 2: 16, 1: 32}.get(itemsize, 8)

    # Widest lane dim (multiple of 128) that divides n -> copy-free reshape.
    lane = 128
    for w in (4096, 2048, 1024, 512, 256, 128):
        if n % w == 0:
            lane = w
            break

    tail = n % lane            # nonzero only when n % 128 != 0 (tail < 128)
    n_main = n - tail
    flat = x.reshape(-1)

    if n_main == 0:
        # Degenerate tiny input (< 128 elements): elementwise cost is trivial,
        # handle it directly instead of padding an extra HBM pass.
        y = jnp.exp(flat.astype(jnp.float32) * scale_f32[0]).astype(orig_dtype)
        return y.reshape(orig_shape)

    rows = n_main // lane
    x2 = (flat[:n_main] if tail else flat).reshape(rows, lane)

    target_block_bytes, vmem_limit_bytes = _tpu_block_config()
    max_block_rows = max(1, target_block_bytes // (lane * itemsize))

    if rows < 2 * sublane:
        # Too few rows to split into two sublane-aligned blocks: one
        # full-extent block (allowed even if rows % sublane != 0).
        block_rows = rows
    else:
        # At least 2 blocks so ("parallel",) shards across v7x's two
        # TensorCores; split as evenly as possible (sublane-aligned) so the
        # last block is full or near-full (no tiny masked final writeback).
        num_blocks = max(2, pl.cdiv(rows, max_block_rows))
        block_rows = min(
            rows,
            ((pl.cdiv(rows, num_blocks) + sublane - 1) // sublane) * sublane,
        )

    grid = (pl.cdiv(rows, block_rows),)

    out2 = pl.pallas_call(
        _scale_exp_kernel,
        out_shape=jax.ShapeDtypeStruct((rows, lane), orig_dtype),
        grid=grid,
        in_specs=[
            pl.BlockSpec(memory_space=pltpu.SMEM),               # f32 scale
            pl.BlockSpec((block_rows, lane), lambda i: (i, 0)),  # x tiles
        ],
        out_specs=pl.BlockSpec((block_rows, lane), lambda i: (i, 0)),
        compiler_params=pltpu.CompilerParams(
            dimension_semantics=("parallel",),
            vmem_limit_bytes=vmem_limit_bytes,
        ),
        cost_estimate=pl.CostEstimate(
            flops=n_main,
            transcendentals=n_main,
            bytes_accessed=2 * n_main * itemsize,
        ),
    )(scale_f32, x2)

    main_out = out2.reshape(-1)
    if tail:
        # Rare path (n % 128 != 0): <128 trailing elements via plain exp;
        # avoids the old pad -> kernel -> slice round trip over the full array.
        tail_out = jnp.exp(
            flat[n_main:].astype(jnp.float32) * scale_f32[0]
        ).astype(orig_dtype)
        return jnp.concatenate([main_out, tail_out]).reshape(orig_shape)
    return main_out.reshape(orig_shape)


class ScaleExp:
    """JAX mirror of the PyTorch ScaleExp module."""

    def __init__(self, init_value=1.0):
        # Parameter kept in f32, exactly as the PyTorch nn.Parameter.
        self.scale = jnp.array([init_value], dtype=jnp.float32)

    def __call__(self, x):
        return scale_exp(x, self.scale)


if __name__ == "__main__":
    key = jax.random.PRNGKey(0)

    # Small NCHW-like input consistent with a detection-head feature map.
    x = jax.random.normal(key, (2, 4, 16, 16), dtype=jnp.float32)
    module = ScaleExp(init_value=1.5)
    out = jax.block_until_ready(module(x))
    ref = jnp.exp(x * module.scale[0])
    assert out.shape == x.shape and out.dtype == x.dtype
    assert jnp.allclose(out, ref, rtol=1e-6, atol=1e-6)

    # Ragged case (element count not a multiple of 128) exercises the tail path.
    x2 = jax.random.normal(jax.random.PRNGKey(1), (2, 3, 131), dtype=jnp.float32)
    out2 = jax.block_until_ready(module(x2))
    ref2 = jnp.exp(x2 * module.scale[0])
    assert out2.shape == x2.shape and out2.dtype == x2.dtype
    assert jnp.allclose(out2, ref2, rtol=1e-6, atol=1e-6)

    print("KERNEL_OK")
</pallas_src>

<mosaic_0001>
module attributes {stable_mosaic.version = 11 : i64} {
  func.func @_scale_exp_kernel(%arg0: i32, %arg1: memref<1xf32, #tpu.memory_space<smem>>, %arg2: memref<1x2048xf32, #tpu.memory_space<vmem>>, %arg3: memref<1x2048xf32, #tpu.memory_space<vmem>>) attributes {dimension_semantics = [#tpu.dimension_semantics<parallel>], iteration_bounds = array<i64: 1>, scalar_prefetch = 0 : i64, scratch_operands = 0 : i64, tpu.core_type = #tpu.core_type<tc>, window_params = [{transform_indices = @transform_0, window_bounds = array<i64: 1>}, {transform_indices = @transform_1, window_bounds = array<i64: 1, 2048>}, {transform_indices = @transform_2, window_bounds = array<i64: 1, 2048>}]} {
    %c0 = arith.constant 0 : index
    %0 = memref.load %arg1[%c0] : memref<1xf32, #tpu.memory_space<smem>>
    %c0_0 = arith.constant 0 : index
    %c0_1 = arith.constant 0 : index
    %1 = vector.load %arg2[%c0_0, %c0_1] : memref<1x2048xf32, #tpu.memory_space<vmem>>, vector<1x2048xf32>
    %2 = vector.broadcast %0 : f32 to vector<1x2048xf32>
    %3 = arith.mulf %1, %2 : vector<1x2048xf32>
    %4 = math.exp %3 : vector<1x2048xf32>
    %c0_2 = arith.constant 0 : index
    %c0_3 = arith.constant 0 : index
    %5 = vector.load %arg3[%c0_2, %c0_3] : memref<1x2048xf32, #tpu.memory_space<vmem>>, vector<1x2048xf32>
    tpu.vector_store %arg3[%c0_2, %c0_3], %4 {strides = array<i32>} : memref<1x2048xf32, #tpu.memory_space<vmem>>, vector<1x2048xf32>,
    return
  }
  func.func @transform_0(%arg0: i32) -> i32 {
    %c0_i32 = arith.constant 0 : i32
    %c0_i32_0 = arith.constant 0 : i32
    return %c0_i32 : i32
  }
  func.func @transform_1(%arg0: i32) -> (i32, i32) {
    %c0_i32 = arith.constant 0 : i32
    %c0_i32_0 = arith.constant 0 : i32
    return %arg0, %c0_i32 : i32, i32
  }
  func.func @transform_2(%arg0: i32) -> (i32, i32) {
    %c0_i32 = arith.constant 0 : i32
    %c0_i32_0 = arith.constant 0 : i32
    return %arg0, %c0_i32 : i32, i32
  }
}

</mosaic_0001>

<bundles_post_ra>
// kernel: tpu_custom_call.1
= control target key start
LH: loop header
LB: loop body
LE: loop exit
PB: predicated region body
PF: predicated region fallthrough
CT: control target
= control target key end

     0   :  { %8 = vsyncpa [#allocation4], 0  ;;  %s150_s0 = inlined_call_operand.<no memory space> [shape: f32[1], index: 0, kind: input, shape index: {}]   ;;  %s151_s1 = inlined_call_operand.hbm [shape: f32[1,2048], index: 1, kind: input, shape index: {}]   ;;  %s152_s2 = inlined_call_operand.hbm [shape: f32[1,2048], index: 2, kind: output, shape index: {}]  }
   0x1   :  { %9 = vsyncpa [#allocation5], 0  ;;  %s106_s9 = smov [#allocation3]   ;;  %s58_s13 = scalar_lea.hbm %s151_s1, 256 }
   0x2   :  { %s18_s10 = sshll.u32 %s106_s9, 4  ;;  %p59_p0 = scmp.ne.s32.totalorder %s151_s1, %s58_s13  ;;  %s19_s10 = int_to_ptr.vmem [resolvable:$true] %s18_s10 }
   0x3   :  { %p62_p1 = scmp.lt.u32.totalorder %s58_s13, %s151_s1 }
   0x5   :  { %p64_p2 = pnand %p62_p1, %p59_p0 }
   0x7   :  { %67 = shalt.err (!%p64_p2)
}
   0x8   :  { %s68_s18 = scalar_lea.vmem %s19_s10, 256  ;;  %p73_p4 = scmp.lt.s32.totalorder %s19_s10, %s19_s10 }
   0x9   :  { %p69_p3 = scmp.ne.s32.totalorder %s19_s10, %s68_s18  ;;  %p74_p5 = scmp.lt.s32.totalorder %s68_s18, %s68_s18 }
   0xb   :  { %p75_p6 = por %p74_p5, %p73_p4 }
   0xd   :  { %p76_p7 = pnand %p75_p6, %p69_p3 }
   0xf   :  { %79 = shalt.err (!%p76_p7)
}
  0x10   :  { %21 = dma.hbm_to_vmem [thread:$0]  %s151_s1, 256, %s19_s10, [#allocation4]  }
  0x11   :  { %102 = dma.done.wait [#allocation4], 256  }
  0x12   :  { %103 = vsyncadd [#allocation4], 4294967040  ;;  %v28_v0 = vstv %s150_s0  ;;  %v26_v1 = vld [vmem:[#allocation3] sm:$0xff]  ;;  %v27_v2 = vld [vmem:[#allocation3 + $0x8] sm:$0xff]  ;;  %s107_s23 = smov [#allocation6]  }
  0x13   :  { %v29_v3 = vmul.f32 %v28_v0, %v26_v1  ;;  %v30_v4 = vmul.f32 %v28_v0, %v27_v2  ;;  %s43_s24 = sshll.u32 %s107_s23, 4  ;;  %s44_s24 = int_to_ptr.vmem [resolvable:$true] %s43_s24 }
  0x14   :  { %s80_s1 = scalar_lea.vmem %s44_s24, 256  ;;  %p85_p9 = scmp.lt.s32.totalorder %s44_s24, %s44_s24 }
  0x15   :  { %v31_v5 = vmul.f32 1.442695, %v29_v3  ;;  %v33_v6 = vmul.f32 1.442695, %v30_v4  ;;  %p81_p8 = scmp.ne.s32.totalorder %s44_s24, %s80_s1  ;;  %p86_p10 = scmp.lt.s32.totalorder %s80_s1, %s80_s1 }
  0x17   :  { %54 = vpow2.f32 %v31_v5  ;;  %p87_p11 = por %p86_p10, %p85_p9 }
  0x18   :  { %56 = vpow2.f32 %v33_v6 }
  0x19   :  { %p88_p12 = pnand %p87_p11, %p81_p8 }
  0x21   :  { %v55_v7 = vpop.eup %54 }
  0x22   :  { %v57_v8 = vpop.eup %56  ;;  %35 = vst [vmem:[#allocation6] sm:$0xff] %v55_v7 }
  0x23   :  { %36 = vst [vmem:[#allocation6 + $0x8] sm:$0xff] %v57_v8 }
  0x24   :  { %91 = shalt.err (!%p88_p12)
}
  0x25   :  { %s92_s26 = scalar_lea.hbm %s152_s2, 256 }
  0x26   :  { %p93_p13 = scmp.ne.s32.totalorder %s152_s2, %s92_s26  ;;  %p96_p0 = scmp.lt.u32.totalorder %s92_s26, %s152_s2 }
  0x28   :  { %p98_p1 = pnand %p96_p0, %p93_p13 }
  0x2a   :  { %101 = shalt.err (!%p98_p1)
}
  0x2b   :  { %46 = dma.vmem_to_hbm [thread:$0]  %s44_s24, 256, %s152_s2, [#allocation5]  }
  0x2c   :  { %104 = dma.done.wait [#allocation5], 256  }
  0x2d   :  { %105 = vsyncadd [#allocation5], 4294967040 }
  0x2e   :  { %50 = vsyncpa [#allocation4], 1 }
  0x2f   :  { %51 = vsyncpa [#allocation5], 1 }

</bundles_post_ra>
